<compile_context>
chip_gen: v7x
topology: tpu7x:2x2x1
jax: 0.10.0
libtpu: 0.0.40
codegen_flags: <defaults>
</compile_context>

<pallas_src>
import functools

import jax
import jax.numpy as jnp
from jax import lax
from jax.experimental import pallas as pl
from jax.experimental.pallas import tpu as pltpu


# ---------------------------------------------------------------------------
# Pass 1: per-channel sum / sum-of-squares over (N, H*W)
# ---------------------------------------------------------------------------
def _bn_stats_kernel(x_ref, sum_ref, sumsq_ref, s_acc, sq_acc):
    # x_ref:   (1, Ct, HWt)  input tile (native dtype)
    # sum_ref/sumsq_ref: (Ct, 1) f32 outputs (same block across reduction axes)
    # s_acc/sq_acc:      (Ct, 1) f32 VMEM scratch accumulators
    first = jnp.logical_and(pl.program_id(1) == 0, pl.program_id(2) == 0)

    @pl.when(first)
    def _():
        s_acc[...] = jnp.zeros_like(s_acc)
        sq_acc[...] = jnp.zeros_like(sq_acc)

    x = x_ref[0].astype(jnp.float32)                       # (Ct, HWt)
    s_acc[...] += jnp.sum(x, axis=1, keepdims=True)        # (Ct, 1)
    sq_acc[...] += jnp.sum(x * x, axis=1, keepdims=True)   # (Ct, 1)

    # Output block is resident across the reduction axes; last write wins.
    sum_ref[...] = s_acc[...]
    sumsq_ref[...] = sq_acc[...]


# ---------------------------------------------------------------------------
# Pass 2: elementwise normalize with folded affine:  y = x * scale + shift
# ---------------------------------------------------------------------------
def _bn_apply_kernel(x_ref, scale_ref, shift_ref, o_ref):
    # x_ref/o_ref: (1, Ct, HWt); scale_ref/shift_ref: (Ct, 1) f32
    x = x_ref[0].astype(jnp.float32)                       # (Ct, HWt)
    y = x * scale_ref[...] + shift_ref[...]                # broadcast over lanes
    o_ref[0] = y.astype(o_ref.dtype)


def _pick_tiles(C, HW):
    """Channel tile: multiple of 8 dividing C (else full C).
    Lane tile: multiple of 128 dividing H*W (else full H*W)."""
    ct = C
    for cand in (32, 16, 8):
        if C % cand == 0:
            ct = cand
            break
    lt = HW
    if HW % 128 == 0:
        for cand in (4096, 2048, 1024, 512, 256, 128):
            if HW % cand == 0:
                lt = cand
                break
    return ct, lt


def meta_batch_norm2d(x_nchw, weight, bias, eps=1e-5, momentum=0.1,
                      running_mean=None, running_var=None):
    """Training-mode BatchNorm2d forward (per-channel batch stats + affine).

    Returns the normalized tensor; if running_mean/running_var are given, also
    returns their updated values (EMA, as F.batch_norm would do in training mode).
    """
    N, C, H, W = x_nchw.shape
    HW = H * W
    L = N * HW
    ct, lt = _pick_tiles(C, HW)
    n_c = C // ct
    n_l = HW // lt

    # Free reshape (trailing-dim merge, no transpose / data movement).
    x3 = x_nchw.reshape(N, C, HW)

    vmem_limit = 32 * 1024 * 1024

    # ---- pass 1: per-channel sum & sum-of-squares ----------------------------
    sums, sumsqs = pl.pallas_call(
        _bn_stats_kernel,
        out_shape=(jax.ShapeDtypeStruct((C, 1), jnp.float32),
                   jax.ShapeDtypeStruct((C, 1), jnp.float32)),
        grid_spec=pltpu.PrefetchScalarGridSpec(
            num_scalar_prefetch=0,
            grid=(n_c, N, n_l),                                  # reduction axes last
            in_specs=[
                pl.BlockSpec((1, ct, lt), lambda c, n, l: (n, c, l)),
            ],
            out_specs=[
                pl.BlockSpec((ct, 1), lambda c, n, l: (c, 0)),
                pl.BlockSpec((ct, 1), lambda c, n, l: (c, 0)),
            ],
            scratch_shapes=[pltpu.VMEM((ct, 1), jnp.float32),
                            pltpu.VMEM((ct, 1), jnp.float32)],
        ),
        compiler_params=pltpu.CompilerParams(
            dimension_semantics=("parallel", "arbitrary", "arbitrary"),
            vmem_limit_bytes=vmem_limit),
    )(x3)

    # ---- tiny JAX glue: fold stats + affine into per-channel scale/shift -----
    mean = sums[:, 0] / L                                        # (C,)
    var = jnp.maximum(sumsqs[:, 0] / L - mean * mean, 0.0)       # biased batch var
    inv_std = lax.rsqrt(var + eps)
    scale = weight.astype(jnp.float32) * inv_std                 # (C,)
    shift = bias.astype(jnp.float32) - mean * scale              # (C,)
    scale2 = scale.reshape(C, 1)
    shift2 = shift.reshape(C, 1)

    # ---- pass 2: elementwise normalize (fully parallel, lane-dense output) ---
    out3 = pl.pallas_call(
        _bn_apply_kernel,
        out_shape=jax.ShapeDtypeStruct((N, C, HW), x_nchw.dtype),
        grid_spec=pltpu.PrefetchScalarGridSpec(
            num_scalar_prefetch=0,
            grid=(N, n_c, n_l),
            in_specs=[
                pl.BlockSpec((1, ct, lt), lambda n, c, l: (n, c, l)),
                pl.BlockSpec((ct, 1), lambda n, c, l: (c, 0)),
                pl.BlockSpec((ct, 1), lambda n, c, l: (c, 0)),
            ],
            out_specs=pl.BlockSpec((1, ct, lt), lambda n, c, l: (n, c, l)),
        ),
        compiler_params=pltpu.CompilerParams(
            dimension_semantics=("parallel", "parallel", "parallel"),
            vmem_limit_bytes=vmem_limit),
    )(x3, scale2, shift2)

    out = out3.reshape(N, C, H, W)                               # free reshape

    if running_mean is not None and running_var is not None:
        # PyTorch updates running_var with the *unbiased* batch variance.
        unbiased = var * (L / max(L - 1, 1))
        new_rm = (1.0 - momentum) * running_mean.astype(jnp.float32) + momentum * mean
        new_rv = (1.0 - momentum) * running_var.astype(jnp.float32) + momentum * unbiased
        return out, new_rm, new_rv
    return out


def _reference_bn(x, weight, bias, eps=1e-5):
    mean = jnp.mean(x, axis=(0, 2, 3), keepdims=True)
    var = jnp.mean((x - mean) ** 2, axis=(0, 2, 3), keepdims=True)
    w = weight.reshape(1, -1, 1, 1)
    b = bias.reshape(1, -1, 1, 1)
    return (x - mean) / jnp.sqrt(var + eps) * w + b


if __name__ == "__main__":
    key = jax.random.PRNGKey(0)
    N, C, H, W = 2, 4, 16, 16
    kx, kw, kb = jax.random.split(key, 3)
    x = jax.random.normal(kx, (N, C, H, W), dtype=jnp.float32)
    # nn.BatchNorm2d default init is weight=1, bias=0; perturb so the affine path
    # is actually exercised.
    weight = jnp.ones((C,), jnp.float32) + 0.1 * jax.random.normal(kw, (C,), jnp.float32)
    bias = 0.1 * jax.random.normal(kb, (C,), jnp.float32)

    fwd = jax.jit(functools.partial(meta_batch_norm2d, eps=1e-5))
    out = fwd(x, weight, bias)
    out = jax.block_until_ready(out)

    ref = _reference_bn(x, weight, bias, eps=1e-5)
    assert out.shape == (N, C, H, W)
    assert out.dtype == x.dtype
    assert jnp.allclose(out, ref, atol=1e-4, rtol=1e-4)
    print("KERNEL_OK")
</pallas_src>

<mosaic_0001>
module attributes {stable_mosaic.version = 11 : i64} {
  func.func @_bn_stats_kernel(%arg0: i32, %arg1: i32, %arg2: i32, %arg3: memref<1x4x256xf32, #tpu.memory_space<vmem>>, %arg4: memref<4x1xf32, #tpu.memory_space<vmem>>, %arg5: memref<4x1xf32, #tpu.memory_space<vmem>>, %arg6: memref<4x1xf32, #tpu.memory_space<vmem>>, %arg7: memref<4x1xf32, #tpu.memory_space<vmem>>) attributes {dimension_semantics = [#tpu.dimension_semantics<parallel>, #tpu.dimension_semantics<arbitrary>, #tpu.dimension_semantics<arbitrary>], iteration_bounds = array<i64: 1, 2, 1>, scalar_prefetch = 0 : i64, scratch_operands = 2 : i64, tpu.core_type = #tpu.core_type<tc>, window_params = [{transform_indices = @transform_0, window_bounds = array<i64: 1, 4, 256>}, {transform_indices = @transform_1, window_bounds = array<i64: 4, 1>}, {transform_indices = @transform_2, window_bounds = array<i64: 4, 1>}]} {
    %c0_i32 = arith.constant 0 : i32
    %0 = arith.cmpi eq, %arg1, %c0_i32 : i32
    %c0_i32_0 = arith.constant 0 : i32
    %1 = arith.cmpi eq, %arg2, %c0_i32_0 : i32
    %2 = arith.andi %0, %1 : i1
    %3 = arith.extui %2 : i1 to i32
    %c0_i32_1 = arith.constant 0 : i32
    %4 = arith.cmpi ne, %3, %c0_i32_1 : i32
    scf.if %4 {
      %cst_21 = arith.constant 0.000000e+00 : f32
      %22 = vector.broadcast %cst_21 : f32 to vector<4x1xf32>
      %c0_22 = arith.constant 0 : index
      %c0_23 = arith.constant 0 : index
      %23 = vector.load %arg6[%c0_22, %c0_23] : memref<4x1xf32, #tpu.memory_space<vmem>>, vector<4x1xf32>
      tpu.vector_store %arg6[%c0_22, %c0_23], %22 {strides = array<i32>} : memref<4x1xf32, #tpu.memory_space<vmem>>, vector<4x1xf32>,
      %cst_24 = arith.constant 0.000000e+00 : f32
      %24 = vector.broadcast %cst_24 : f32 to vector<4x1xf32>
      %c0_25 = arith.constant 0 : index
      %c0_26 = arith.constant 0 : index
      %25 = vector.load %arg7[%c0_25, %c0_26] : memref<4x1xf32, #tpu.memory_space<vmem>>, vector<4x1xf32>
      tpu.vector_store %arg7[%c0_25, %c0_26], %24 {strides = array<i32>} : memref<4x1xf32, #tpu.memory_space<vmem>>, vector<4x1xf32>,
    } else {
    }
    %c0 = arith.constant 0 : index
    %c0_2 = arith.constant 0 : index
    %c0_3 = arith.constant 0 : index
    %5 = vector.load %arg3[%c0, %c0_2, %c0_3] : memref<1x4x256xf32, #tpu.memory_space<vmem>>, vector<1x4x256xf32>
    %6 = vector.shape_cast %5 : vector<1x4x256xf32> to vector<4x256xf32>
    %c0_4 = arith.constant 0 : index
    %c0_5 = arith.constant 0 : index
    %7 = vector.load %arg6[%c0_4, %c0_5] : memref<4x1xf32, #tpu.memory_space<vmem>>, vector<4x1xf32>
    %cst = arith.constant dense<0.000000e+00> : vector<4xf32>
    %8 = vector.multi_reduction <add>, %6, %cst [1] : vector<4x256xf32> to vector<4xf32>
    %9 = vector.shape_cast %8 : vector<4xf32> to vector<4x1xf32>
    %10 = arith.addf %7, %9 : vector<4x1xf32>
    %c0_6 = arith.constant 0 : index
    %c0_7 = arith.constant 0 : index
    %11 = vector.load %arg6[%c0_6, %c0_7] : memref<4x1xf32, #tpu.memory_space<vmem>>, vector<4x1xf32>
    tpu.vector_store %arg6[%c0_6, %c0_7], %10 {strides = array<i32>} : memref<4x1xf32, #tpu.memory_space<vmem>>, vector<4x1xf32>,
    %c0_8 = arith.constant 0 : index
    %c0_9 = arith.constant 0 : index
    %12 = vector.load %arg7[%c0_8, %c0_9] : memref<4x1xf32, #tpu.memory_space<vmem>>, vector<4x1xf32>
    %13 = arith.mulf %6, %6 : vector<4x256xf32>
    %cst_10 = arith.constant dense<0.000000e+00> : vector<4xf32>
    %14 = vector.multi_reduction <add>, %13, %cst_10 [1] : vector<4x256xf32> to vector<4xf32>
    %15 = vector.shape_cast %14 : vector<4xf32> to vector<4x1xf32>
    %16 = arith.addf %12, %15 : vector<4x1xf32>
    %c0_11 = arith.constant 0 : index
    %c0_12 = arith.constant 0 : index
    %17 = vector.load %arg7[%c0_11, %c0_12] : memref<4x1xf32, #tpu.memory_space<vmem>>, vector<4x1xf32>
    tpu.vector_store %arg7[%c0_11, %c0_12], %16 {strides = array<i32>} : memref<4x1xf32, #tpu.memory_space<vmem>>, vector<4x1xf32>,
    %c0_13 = arith.constant 0 : index
    %c0_14 = arith.constant 0 : index
    %18 = vector.load %arg6[%c0_13, %c0_14] : memref<4x1xf32, #tpu.memory_space<vmem>>, vector<4x1xf32>
    %c0_15 = arith.constant 0 : index
    %c0_16 = arith.constant 0 : index
    %19 = vector.load %arg4[%c0_15, %c0_16] : memref<4x1xf32, #tpu.memory_space<vmem>>, vector<4x1xf32>
    tpu.vector_store %arg4[%c0_15, %c0_16], %18 {strides = array<i32>} : memref<4x1xf32, #tpu.memory_space<vmem>>, vector<4x1xf32>,
    %c0_17 = arith.constant 0 : index
    %c0_18 = arith.constant 0 : index
    %20 = vector.load %arg7[%c0_17, %c0_18] : memref<4x1xf32, #tpu.memory_space<vmem>>, vector<4x1xf32>
    %c0_19 = arith.constant 0 : index
    %c0_20 = arith.constant 0 : index
    %21 = vector.load %arg5[%c0_19, %c0_20] : memref<4x1xf32, #tpu.memory_space<vmem>>, vector<4x1xf32>
    tpu.vector_store %arg5[%c0_19, %c0_20], %20 {strides = array<i32>} : memref<4x1xf32, #tpu.memory_space<vmem>>, vector<4x1xf32>,
    return
  }
  func.func @transform_0(%arg0: i32, %arg1: i32, %arg2: i32) -> (i32, i32, i32) {
    %c0_i32 = arith.constant 0 : i32
    return %arg1, %arg0, %arg2 : i32, i32, i32
  }
  func.func @transform_1(%arg0: i32, %arg1: i32, %arg2: i32) -> (i32, i32) {
    %c0_i32 = arith.constant 0 : i32
    %c0_i32_0 = arith.constant 0 : i32
    return %arg0, %c0_i32 : i32, i32
  }
  func.func @transform_2(%arg0: i32, %arg1: i32, %arg2: i32) -> (i32, i32) {
    %c0_i32 = arith.constant 0 : i32
    %c0_i32_0 = arith.constant 0 : i32
    return %arg0, %c0_i32 : i32, i32
  }
}

module attributes {stable_mosaic.version = 11 : i64} {
  func.func @_bn_apply_kernel(%arg0: i32, %arg1: i32, %arg2: i32, %arg3: memref<1x4x256xf32, #tpu.memory_space<vmem>>, %arg4: memref<4x1xf32, #tpu.memory_space<vmem>>, %arg5: memref<4x1xf32, #tpu.memory_space<vmem>>, %arg6: memref<1x4x256xf32, #tpu.memory_space<vmem>>) attributes {dimension_semantics = [#tpu.dimension_semantics<parallel>, #tpu.dimension_semantics<parallel>, #tpu.dimension_semantics<parallel>], iteration_bounds = array<i64: 2, 1, 1>, scalar_prefetch = 0 : i64, scratch_operands = 0 : i64, tpu.core_type = #tpu.core_type<tc>, window_params = [{transform_indices = @transform_0, window_bounds = array<i64: 1, 4, 256>}, {transform_indices = @transform_1, window_bounds = array<i64: 4, 1>}, {transform_indices = @transform_2, window_bounds = array<i64: 4, 1>}, {transform_indices = @transform_3, window_bounds = array<i64: 1, 4, 256>}]} {
    %c0 = arith.constant 0 : index
    %c0_0 = arith.constant 0 : index
    %c0_1 = arith.constant 0 : index
    %0 = vector.load %arg3[%c0, %c0_0, %c0_1] : memref<1x4x256xf32, #tpu.memory_space<vmem>>, vector<1x4x256xf32>
    %1 = vector.shape_cast %0 : vector<1x4x256xf32> to vector<4x256xf32>
    %c0_2 = arith.constant 0 : index
    %c0_3 = arith.constant 0 : index
    %2 = vector.load %arg4[%c0_2, %c0_3] : memref<4x1xf32, #tpu.memory_space<vmem>>, vector<4x1xf32>
    %3 = vector.broadcast %2 : vector<4x1xf32> to vector<4x256xf32>
    %4 = arith.mulf %1, %3 : vector<4x256xf32>
    %c0_4 = arith.constant 0 : index
    %c0_5 = arith.constant 0 : index
    %5 = vector.load %arg5[%c0_4, %c0_5] : memref<4x1xf32, #tpu.memory_space<vmem>>, vector<4x1xf32>
    %6 = vector.broadcast %5 : vector<4x1xf32> to vector<4x256xf32>
    %7 = arith.addf %4, %6 : vector<4x256xf32>
    %c0_6 = arith.constant 0 : index
    %c0_7 = arith.constant 0 : index
    %c0_8 = arith.constant 0 : index
    %8 = vector.load %arg6[%c0_6, %c0_7, %c0_8] : memref<1x4x256xf32, #tpu.memory_space<vmem>>, vector<1x4x256xf32>
    %9 = vector.shape_cast %8 : vector<1x4x256xf32> to vector<4x256xf32>
    %10 = vector.shape_cast %7 : vector<4x256xf32> to vector<1x4x256xf32>
    tpu.vector_store %arg6[%c0_6, %c0_7, %c0_8], %10 {strides = array<i32>} : memref<1x4x256xf32, #tpu.memory_space<vmem>>, vector<1x4x256xf32>,
    return
  }
  func.func @transform_0(%arg0: i32, %arg1: i32, %arg2: i32) -> (i32, i32, i32) {
    %c0_i32 = arith.constant 0 : i32
    return %arg0, %arg1, %arg2 : i32, i32, i32
  }
  func.func @transform_1(%arg0: i32, %arg1: i32, %arg2: i32) -> (i32, i32) {
    %c0_i32 = arith.constant 0 : i32
    %c0_i32_0 = arith.constant 0 : i32
    return %arg1, %c0_i32 : i32, i32
  }
  func.func @transform_2(%arg0: i32, %arg1: i32, %arg2: i32) -> (i32, i32) {
    %c0_i32 = arith.constant 0 : i32
    %c0_i32_0 = arith.constant 0 : i32
    return %arg1, %c0_i32 : i32, i32
  }
  func.func @transform_3(%arg0: i32, %arg1: i32, %arg2: i32) -> (i32, i32, i32) {
    %c0_i32 = arith.constant 0 : i32
    return %arg0, %arg1, %arg2 : i32, i32, i32
  }
}

</mosaic_0001>

<bundles_post_ra>
// kernel: meta_batch_norm2d.2
= control target key start
LH: loop header
LB: loop body
LE: loop exit
PB: predicated region body
PF: predicated region fallthrough
CT: control target
= control target key end

     0   :  { %s422_s9 = smov 0   ;;  %s424_s10 = smov 0   ;;  %s458_s0 = inlined_call_operand.vmem [shape: f32[2,4,256], index: 0, kind: input, shape index: {}]   ;;  %s459_s1 = inlined_call_operand.vmem [shape: f32[4,1], index: 1, kind: output, shape index: {0}]   ;;  %s460_s2 = inlined_call_operand.vmem [shape: f32[4,1], index: 2, kind: output, shape index: {1}]  }
   0x1   :  { %s426_s11 = smov 0  }
   0x2 LB: > { %s28_s12 = sadd.s32 1, %s400_s10  ;;  %p346_p0 = scmp.ge.s32.totalorder %s404_s11, 1  ;;  %s404_s11 = sphi %s426_s11, %s13_s11   ;;  %s400_s10 = sphi %s424_s10, %s462_s10   ;;  %s396_s9 = sphi %s422_s9, %s461_s9  }
   0x3   : > { %p30_p1 = scmp.ge.s32.totalorder %s28_s12, 2  ;;  %p147_p2 = scmp.lt.s32.totalorder %s404_s11, 3 }
   0x5   : > { %s464_s12 = smov (%p30_p1, %s28_s12), 0  ;;  %p148_p3 = pnand %p346_p0, %p147_p2 }
   0x6   : > { %p181_p4 = scmp.lt.s32.totalorder (!%p148_p3), %s396_s9, 1  ;;  %p202_p5 = scmp.eq.s32.totalorder (!%p148_p3), %s396_s9, 0 }
   0x7   : > { %151 = sbr.rel (%p148_p3) target bundleno = 184 (0xb8), region = 24 }
   0xe   : > { %s466_s9 = smov (!%p181_p4, %s396_s9), 1  ;;  %207 = sbr.rel (!%p202_p5) target bundleno = 21 (0x15), region = 28 }
   0xf   : > { %s354_s13 = sshll.u32 %s466_s9, 3  ;;  %vm208_vm0 = vcmask (%p202_p5), 3072   ;;  %v406_v0 = vmov (%p202_p5), 0.0  }
  0x10   : > { %s192_s16 = scalar_lea.vmem %s458_s0, %s354_s13  ;;  %209 = vst.msk [vmem:[#allocation2] sm:$0xf] (%p202_p5), %vm208_vm0, %v406_v0  ;;  %210 = vst.msk [vmem:[#allocation3] sm:$0xf] (%p202_p5), %vm208_vm0, %v406_v0 }
  0x15 PF: > { %v211_v1 = vld [vmem:[%s192_s16] sm:$0xff]  ;;  %vm216_vm1 = vcmask 1043456   ;;  %vm223_vm2 = vcmask 3072  }
  0x16   : > { %v214_v2 = vcombine.high %v211_v1, %v211_v1  ;;  %v217_v3 = vsel %vm216_vm1, %v211_v1, 0.0  ;;  %v226_v4 = vmul.f32 %v211_v1, %v211_v1 }
  0x17   : > { %v212_v11 = vld [vmem:[#allocation2] sm:$0xf]  ;;  %v225_v14 = vld [vmem:[#allocation3] sm:$0xf] }
  0x18   : > { %v218_v5 = vsel %vm216_vm1, %v214_v2, 0.0  ;;  %v228_v6 = vcombine.high %v226_v4, %v226_v4  ;;  %v230_v7 = vsel %vm216_vm1, %v226_v4, 0.0 }
  0x19   : > { %v219_v8 = vadd.f32 %v218_v5, %v217_v3 }
  0x1a   : > { %v231_v9 = vsel %vm216_vm1, %v228_v6, 0.0 }
  0x1b   : > { %220 = vadd.xlane.f32.xlu0 %v219_v8  ;;  %v232_v10 = vadd.f32 %v231_v9, %v230_v7 }
  0x1f   : > { %233 = vadd.xlane.f32.xlu0 %v232_v10 }
  0xa8   : > { %v221_v12 = vpop.xlane.xlu0 %220 }
  0xa9   : > { %v222_v13 = vadd.f32 %v221_v12, %v212_v11 }
  0xab   : > { %224 = vst.msk [vmem:[#allocation2] sm:$0xf] %vm223_vm2, %v222_v13 }
  0xac   : > { %v234_v15 = vpop.xlane.xlu0 %233 }
  0xad   : > { %v235_v16 = vadd.f32 %v234_v15, %v225_v14 }
  0xaf   : > { %236 = vst.msk [vmem:[#allocation3] sm:$0xf] %vm223_vm2, %v235_v16 }
  0xb2   : > { %v237_v17 = vld [vmem:[#allocation2] sm:$0xf] }
  0xb3   : > { %238 = vst.msk [vmem:[%s459_s1] sm:$0xf] %vm223_vm2, %v237_v17 }
  0xb6   : > { %v239_v18 = vld [vmem:[#allocation3] sm:$0xf] }
  0xb7   : > { %240 = vst.msk [vmem:[%s460_s2] sm:$0xf] %vm223_vm2, %v239_v18 }
  0xb8 PF: > { %s13_s11 = sadd.s32 1, %s404_s11   ;;  %s461_s9 = smov %s400_s10 }
  0xb9   : > { %p10_p6 = scmp.ge.s32.totalorder %s13_s11, 4   ;;  %s462_s10 = smov %s464_s12 }
  0xbb   :  { %12 = sbr.rel (!%p10_p6) target bundleno = 2 (0x2), region = 70 }

// kernel: meta_batch_norm2d.3
= control target key start
LH: loop header
LB: loop body
LE: loop exit
PB: predicated region body
PF: predicated region fallthrough
CT: control target
= control target key end

     0   :  { %s535_s12 = smov 0   ;;  %s537_s13 = smov 0   ;;  %s574_s0 = inlined_call_operand.vmem [shape: f32[2,4,256], index: 0, kind: input, shape index: {}]   ;;  %s575_s1 = inlined_call_operand.vmem [shape: f32[4,1], index: 1, kind: input, shape index: {}]   ;;  %s576_s2 = inlined_call_operand.vmem [shape: f32[4,1], index: 2, kind: input, shape index: {}]   ;;  %s577_s3 = inlined_call_operand.vmem [shape: f32[2,4,256], index: 3, kind: output, shape index: {}]  }
   0x1   :  { %s539_s14 = smov 0  }
   0x2 LB: > { %s32_s15 = sadd.s32 1, %s507_s13  ;;  %p453_p0 = scmp.ge.s32.totalorder %s511_s14, 1  ;;  %s511_s14 = sphi %s539_s14, %s13_s14   ;;  %s507_s13 = sphi %s537_s13, %s579_s13   ;;  %s503_s12 = sphi %s535_s12, %s578_s12  }
   0x3   : > { %p34_p1 = scmp.ge.s32.totalorder %s32_s15, 2  ;;  %p191_p2 = scmp.lt.s32.totalorder %s511_s14, 3 }
   0x5   : > { %s581_s15 = smov (%p34_p1, %s32_s15), 0  ;;  %p192_p3 = pnand %p453_p0, %p191_p2 }
   0x6   : > { %v276_v0 = vld [vmem:[%s575_s1] sm:$0xf] (!%p192_p3)  ;;  %v513_v1 = vmov (!%p192_p3), 0   ;;  %p240_p4 = scmp.lt.s32.totalorder (!%p192_p3), %s503_s12, 1  ;;  %v514_v3 = vmov (!%p192_p3), 839922192   ;;  %v284_v5 = vlaneseq (!%p192_p3) }
   0x7   : > { %195 = sbr.rel (%p192_p3) target bundleno = 145 (0x91), region = 32  ;;  %488 = vset.pattern.permute.xlu0 (!%p192_p3), %v513_v1  ;;  %v290_v2 = vld [vmem:[%s576_s2] sm:$0xf] (!%p192_p3)  ;;  %v282_v4 = vunpack.c.l.s4 (!%p192_p3), %v514_v3 }
   0x8   : > { %279 = vperm.xlu0 (!%p192_p3), %488, %v276_v0   ;;  %v285_v7 = vshrl.u32 (!%p192_p3), %v284_v5, 7 }
   0x9   : > { %v283_v6 = vunpack.c.0.s8 (!%p192_p3), %v282_v4 }
   0xb   : > { %v286_v8 = vsub.s32 (!%p192_p3), %v283_v6, %v285_v7 }
   0xc   : > { %293 = vperm.xlu0 (!%p192_p3), %488, %v290_v2  }
   0xe   : > { %s583_s12 = smov (!%p240_p4, %s503_s12), 1 }
   0xf   : > { %s460_s20 = sshll.u32 %s583_s12, 3 }
  0x10   : > { %s251_s23 = scalar_lea.vmem %s574_s0, %s460_s20  ;;  %s273_s26 = scalar_lea.vmem %s577_s3, %s460_s20 }
  0x11   : > { %v275_v11 = vld [vmem:[%s251_s23] sm:$0xff] }
  0x87   : > { %v280_v9 = vpop.permute.xlu0 %279 }
  0x88   : > { %v287_v10 = vrot.slane %v280_v9, %v286_v8 }
  0x8a   : > { %v289_v13 = vmul.f32 %v287_v10, %v275_v11 }
  0x8b   : > { %v294_v12 = vpop.permute.xlu0 %293 }
  0x8c   : > { %v301_v14 = vrot.slane %v294_v12, %v286_v8 }
  0x8e   : > { %v303_v15 = vadd.f32 %v301_v14, %v289_v13 }
  0x90   : > { %304 = vst [vmem:[%s273_s26] sm:$0xff] %v303_v15 }
  0x91 PF: > { %s13_s14 = sadd.s32 1, %s511_s14   ;;  %s578_s12 = smov %s507_s13 }
  0x92   : > { %p10_p5 = scmp.ge.s32.totalorder %s13_s14, 4   ;;  %s579_s13 = smov %s581_s15 }
  0x94   :  { %12 = sbr.rel (!%p10_p5) target bundleno = 2 (0x2), region = 68 }

</bundles_post_ra>
